<compile_context>
chip_gen: v7x
topology: tpu7x:2x2x1
jax: 0.10.0
libtpu: 0.0.40
codegen_flags: <defaults>
</compile_context>

<pallas_src>
import functools

import jax
import jax.numpy as jnp
from jax.experimental import pallas as pl
from jax.experimental.pallas import tpu as pltpu


def _diff_avg_y_kernel(out_ref, y_ref, partial_ref, *, total_batch, needs_mask):
    """One grid step over a (Bt, C, D) block of `out` and `y`.

    Writes per-lane (d) partial sums of |out - y| / (|mean_c(y)| + 1) for this
    block into partial_ref (shape (1, 1, D)).  Every grid step is independent,
    so the grid axis can be "parallel".
    """
    o = out_ref[...].astype(jnp.float32)          # (Bt, C, D)
    y = y_ref[...].astype(jnp.float32)            # (Bt, C, D)
    bt, c, _ = o.shape
    inv_c = 1.0 / c

    # Denominator depends only on (b, d): reduce over the channel axis first
    # (sublane reduce -> XLU), then do Bt*D reciprocals instead of a broadcast
    # Bt*C*D f32 divide on the VALU.  Mathematically identical.
    abs_diff_sum = jnp.sum(jnp.abs(o - y), axis=1, keepdims=True)   # (Bt, 1, D)
    mean_y = jnp.sum(y, axis=1, keepdims=True) * inv_c              # (Bt, 1, D)
    inv_denom = pl.reciprocal(jnp.abs(mean_y) + 1.0, approx=False)  # (Bt, 1, D)
    contrib = abs_diff_sum * inv_denom                              # (Bt, 1, D)

    if needs_mask:
        # Last block may be padded past B; padded rows hold unspecified data,
        # so zero their contribution before the batch reduce.
        b_idx = (pl.program_id(0) * bt
                 + jax.lax.broadcasted_iota(jnp.int32, contrib.shape, 0))
        contrib = jnp.where(b_idx < total_batch, contrib, 0.0)

    # Lane-dense per-block partial sum (no per-step reduce-to-scalar and no
    # serialized scalar read-modify-write across grid steps).
    partial_ref[...] = jnp.sum(contrib, axis=0, keepdims=True)

    # NOTE: std_y in the PyTorch module is dead code (never used in the loss),
    # so it is intentionally not computed here.


def diff_avg_y(out, y, *, block_bytes_target=4 * 1024 * 1024):
    """Pallas implementation of diff_avg_y.forward(out, y) for (B, C, D) inputs."""
    assert out.shape == y.shape and y.ndim == 3, (out.shape, y.shape)
    B, C, D = y.shape
    itemsize = jnp.dtype(y.dtype).itemsize
    per_batch_bytes = C * D * itemsize

    # Batch-tile so each input block is ~block_bytes_target: keeps the HBM
    # stream near roofline while fitting the double-buffered pipeline in VMEM.
    # TODO(synk): if a single batch element (C*D) already exceeds the VMEM
    # budget, tile the channel axis with a two-accumulator single-pass scheme.
    bt = int(max(1, min(B, block_bytes_target // max(per_batch_bytes, 1))))
    num_blocks = (B + bt - 1) // bt
    needs_mask = (B % bt) != 0

    cost = pl.CostEstimate(
        flops=4 * B * C * D,
        transcendentals=0,
        bytes_accessed=2 * B * C * D * itemsize + num_blocks * D * 4,
    )

    kernel = functools.partial(
        _diff_avg_y_kernel, total_batch=B, needs_mask=needs_mask)

    partials = pl.pallas_call(
        kernel,
        out_shape=jax.ShapeDtypeStruct((num_blocks, 1, D), jnp.float32),
        grid_spec=pltpu.PrefetchScalarGridSpec(
            num_scalar_prefetch=0,
            grid=(num_blocks,),
            in_specs=[
                pl.BlockSpec((bt, C, D), lambda i: (i, 0, 0)),  # out
                pl.BlockSpec((bt, C, D), lambda i: (i, 0, 0)),  # y
            ],
            out_specs=pl.BlockSpec((1, 1, D), lambda i: (i, 0, 0)),
        ),
        compiler_params=pltpu.CompilerParams(
            # No cross-step state -> independent steps -> megacore-shardable.
            dimension_semantics=("parallel",),
            vmem_limit_bytes=32 * 1024 * 1024,
        ),
        cost_estimate=cost,
    )(out, y)

    # Tiny final reduction + normalization (num_blocks * D floats).
    return jnp.sum(partials) / (B * C * D)


def _reference(out, y):
    o = out.astype(jnp.float32)
    yy = y.astype(jnp.float32)
    mean_y = jnp.mean(yy, axis=1, keepdims=True)
    return jnp.mean(jnp.abs(o - yy) / (jnp.abs(mean_y) + 1.0))


if __name__ == "__main__":
    # Small deterministic inputs: batch=8, channels=4, feature=128 (lane-aligned).
    key = jax.random.PRNGKey(0)
    k1, k2 = jax.random.split(key)
    B, C, D = 8, 4, 128
    out = jax.random.normal(k1, (B, C, D), dtype=jnp.float32)
    y = jax.random.normal(k2, (B, C, D), dtype=jnp.float32)

    ref = jax.block_until_ready(_reference(out, y))

    # 1) Default blocking (whole batch fits one block at this tiny demo shape).
    loss = jax.block_until_ready(diff_avg_y(out, y))
    assert jnp.allclose(loss, ref, rtol=1e-5, atol=1e-6), (loss, ref)

    # 2) Multi-block, divisible path (Bt=2 -> 4 grid steps, no masking).
    loss_mb = jax.block_until_ready(
        diff_avg_y(out, y, block_bytes_target=2 * C * D * 4))
    assert jnp.allclose(loss_mb, ref, rtol=1e-5, atol=1e-6), (loss_mb, ref)

    # 3) Multi-block, non-divisible path (Bt=3 over B=8 -> blocks [3,3,2],
    #    exercises the in-kernel padded-row mask).
    loss_pad = jax.block_until_ready(
        diff_avg_y(out, y, block_bytes_target=3 * C * D * 4))
    assert jnp.allclose(loss_pad, ref, rtol=1e-5, atol=1e-6), (loss_pad, ref)

    # 4) bf16 inputs (kernel casts to f32 internally, as does the reference).
    out_bf = out.astype(jnp.bfloat16)
    y_bf = y.astype(jnp.bfloat16)
    ref_bf = jax.block_until_ready(_reference(out_bf, y_bf))
    loss_bf = jax.block_until_ready(diff_avg_y(out_bf, y_bf))
    assert jnp.allclose(loss_bf, ref_bf, rtol=1e-4, atol=1e-5), (loss_bf, ref_bf)

    print("KERNEL_OK")
</pallas_src>

<mosaic_0001>
module attributes {stable_mosaic.version = 11 : i64} {
  func.func @_diff_avg_y_kernel(%arg0: i32, %arg1: memref<8x4x128xf32, #tpu.memory_space<vmem>>, %arg2: memref<8x4x128xf32, #tpu.memory_space<vmem>>, %arg3: memref<1x1x128xf32, #tpu.memory_space<vmem>>) attributes {dimension_semantics = [#tpu.dimension_semantics<parallel>], iteration_bounds = array<i64: 1>, scalar_prefetch = 0 : i64, scratch_operands = 0 : i64, tpu.core_type = #tpu.core_type<tc>, window_params = [{transform_indices = @transform_0, window_bounds = array<i64: 8, 4, 128>}, {transform_indices = @transform_1, window_bounds = array<i64: 8, 4, 128>}, {transform_indices = @transform_2, window_bounds = array<i64: 1, 1, 128>}]} {
    %c0 = arith.constant 0 : index
    %c0_0 = arith.constant 0 : index
    %c0_1 = arith.constant 0 : index
    %0 = vector.load %arg1[%c0, %c0_0, %c0_1] : memref<8x4x128xf32, #tpu.memory_space<vmem>>, vector<8x4x128xf32>
    %c0_2 = arith.constant 0 : index
    %c0_3 = arith.constant 0 : index
    %c0_4 = arith.constant 0 : index
    %1 = vector.load %arg2[%c0_2, %c0_3, %c0_4] : memref<8x4x128xf32, #tpu.memory_space<vmem>>, vector<8x4x128xf32>
    %2 = arith.subf %0, %1 : vector<8x4x128xf32>
    %3 = math.absf %2 : vector<8x4x128xf32>
    %cst = arith.constant dense<0.000000e+00> : vector<8x128xf32>
    %4 = vector.multi_reduction <add>, %3, %cst [1] : vector<8x4x128xf32> to vector<8x128xf32>
    %5 = vector.shape_cast %4 : vector<8x128xf32> to vector<8x1x128xf32>
    %cst_5 = arith.constant dense<0.000000e+00> : vector<8x128xf32>
    %6 = vector.multi_reduction <add>, %1, %cst_5 [1] : vector<8x4x128xf32> to vector<8x128xf32>
    %7 = vector.shape_cast %6 : vector<8x128xf32> to vector<8x1x128xf32>
    %cst_6 = arith.constant 2.500000e-01 : f32
    %8 = vector.broadcast %cst_6 : f32 to vector<8x1x128xf32>
    %9 = arith.mulf %7, %8 : vector<8x1x128xf32>
    %10 = math.absf %9 : vector<8x1x128xf32>
    %cst_7 = arith.constant 1.000000e+00 : f32
    %11 = vector.broadcast %cst_7 : f32 to vector<8x1x128xf32>
    %12 = arith.addf %10, %11 : vector<8x1x128xf32>
    %13 = tpu.reciprocal %12 : vector<8x1x128xf32> -> vector<8x1x128xf32>
    %14 = arith.mulf %5, %13 : vector<8x1x128xf32>
    %cst_8 = arith.constant dense<0.000000e+00> : vector<1x128xf32>
    %15 = vector.multi_reduction <add>, %14, %cst_8 [0] : vector<8x1x128xf32> to vector<1x128xf32>
    %16 = vector.shape_cast %15 : vector<1x128xf32> to vector<1x1x128xf32>
    %c0_9 = arith.constant 0 : index
    %c0_10 = arith.constant 0 : index
    %c0_11 = arith.constant 0 : index
    %17 = vector.load %arg3[%c0_9, %c0_10, %c0_11] : memref<1x1x128xf32, #tpu.memory_space<vmem>>, vector<1x1x128xf32>
    tpu.vector_store %arg3[%c0_9, %c0_10, %c0_11], %16 {strides = array<i32>} : memref<1x1x128xf32, #tpu.memory_space<vmem>>, vector<1x1x128xf32>,
    return
  }
  func.func @transform_0(%arg0: i32) -> (i32, i32, i32) {
    %c0_i32 = arith.constant 0 : i32
    %c0_i32_0 = arith.constant 0 : i32
    %c0_i32_1 = arith.constant 0 : i32
    return %arg0, %c0_i32, %c0_i32_0 : i32, i32, i32
  }
  func.func @transform_1(%arg0: i32) -> (i32, i32, i32) {
    %c0_i32 = arith.constant 0 : i32
    %c0_i32_0 = arith.constant 0 : i32
    %c0_i32_1 = arith.constant 0 : i32
    return %arg0, %c0_i32, %c0_i32_0 : i32, i32, i32
  }
  func.func @transform_2(%arg0: i32) -> (i32, i32, i32) {
    %c0_i32 = arith.constant 0 : i32
    %c0_i32_0 = arith.constant 0 : i32
    %c0_i32_1 = arith.constant 0 : i32
    return %arg0, %c0_i32, %c0_i32_0 : i32, i32, i32
  }
}

</mosaic_0001>

<bundles_post_ra>
// kernel: tpu_custom_call.1
= control target key start
LH: loop header
LB: loop body
LE: loop exit
PB: predicated region body
PF: predicated region fallthrough
CT: control target
= control target key end

     0   :  { %7 = vsyncpa [#allocation3], 0  ;;  %s460_s0 = inlined_call_operand.hbm [shape: f32[8,4,128], index: 0, kind: input, shape index: {}]   ;;  %s461_s1 = inlined_call_operand.hbm [shape: f32[8,4,128], index: 1, kind: input, shape index: {}]   ;;  %s462_s2 = inlined_call_operand.hbm [shape: f32[1,1,128], index: 2, kind: output, shape index: {}]  }
   0x1   :  { %8 = vsyncpa [#allocation6], 0 }
   0x2   :  { %9 = vsyncpa [#allocation4], 0  ;;  %s342_s9 = smov [#allocation2]   ;;  %s270_s13 = scalar_lea.hbm %s460_s0, 512 }
   0x3   :  { %s15_s10 = sshll.u32 %s342_s9, 4  ;;  %p271_p0 = scmp.ne.s32.totalorder %s460_s0, %s270_s13  ;;  %s16_s10 = int_to_ptr.vmem [resolvable:$true] %s15_s10 }
   0x4   :  { %p274_p1 = scmp.lt.u32.totalorder %s270_s13, %s460_s0 }
   0x6   :  { %p276_p2 = pnand %p274_p1, %p271_p0 }
   0x8   :  { %279 = shalt.err (!%p276_p2)
}
   0x9   :  { %s280_s18 = scalar_lea.vmem %s16_s10, 512  ;;  %p285_p4 = scmp.lt.s32.totalorder %s16_s10, %s16_s10 }
   0xa   :  { %p281_p3 = scmp.ne.s32.totalorder %s16_s10, %s280_s18  ;;  %p286_p5 = scmp.lt.s32.totalorder %s280_s18, %s280_s18 }
   0xc   :  { %p287_p6 = por %p286_p5, %p285_p4 }
   0xe   :  { %p288_p7 = pnand %p287_p6, %p281_p3 }
  0x10   :  { %291 = shalt.err (!%p288_p7)
}
  0x11   :  { %s343_s19 = smov 64   ;;  %s344_s20 = smov 4  }
  0x12   :  { %21 = dma.hbm_to_vmem [thread:$0]  %s460_s0, 512, %s16_s10, [#allocation3], %s343_s19, %s343_s19, %s344_s20  }
  0x13   :  { %s345_s23 = smov [#allocation5]   ;;  %s292_s27 = scalar_lea.hbm %s461_s1, 512 }
  0x14   :  { %s27_s24 = sshll.u32 %s345_s23, 4  ;;  %p293_p8 = scmp.ne.s32.totalorder %s461_s1, %s292_s27  ;;  %s28_s24 = int_to_ptr.vmem [resolvable:$true] %s27_s24 }
  0x15   :  { %p296_p9 = scmp.lt.u32.totalorder %s292_s27, %s461_s1 }
  0x17   :  { %p298_p10 = pnand %p296_p9, %p293_p8 }
  0x19   :  { %301 = shalt.err (!%p298_p10)
}
  0x1a   :  { %s302_s4 = scalar_lea.vmem %s28_s24, 512  ;;  %p307_p12 = scmp.lt.s32.totalorder %s28_s24, %s28_s24 }
  0x1b   :  { %p303_p11 = scmp.ne.s32.totalorder %s28_s24, %s302_s4  ;;  %p308_p13 = scmp.lt.s32.totalorder %s302_s4, %s302_s4 }
  0x1d   :  { %p309_p0 = por %p308_p13, %p307_p12 }
  0x1f   :  { %p310_p1 = pnand %p309_p0, %p303_p11 }
  0x21   :  { %313 = shalt.err (!%p310_p1)
}
  0x22   :  { %33 = dma.hbm_to_vmem [thread:$0]  %s461_s1, 512, %s28_s24, [#allocation6], %s343_s19, %s343_s19, %s344_s20  }
  0x23   :  { %336 = dma.done.wait [#allocation3], 512  }
  0x24   :  { %337 = vsyncadd [#allocation3], 4294966784 }
  0x25   :  { %338 = dma.done.wait [#allocation6], 512  }
  0x26   :  { %339 = vsyncadd [#allocation6], 4294966784  ;;  %v40_v0 = vld [vmem:[#allocation2] sm:$0xf]  ;;  %v41_v1 = vld [vmem:[#allocation2 + $0x4] sm:$0xf] }
  0x27   :  { %v42_v2 = vld [vmem:[#allocation2 + $0x8] sm:$0xf]  ;;  %v43_v3 = vld [vmem:[#allocation2 + $0xc] sm:$0xf]  ;;  %v44_v4 = vld [vmem:[#allocation2 + $0x10] sm:$0xf] }
  0x28   :  { %v45_v5 = vld [vmem:[#allocation2 + $0x14] sm:$0xf]  ;;  %v46_v6 = vld [vmem:[#allocation2 + $0x18] sm:$0xf]  ;;  %v48_v7 = vld [vmem:[#allocation5] sm:$0xf] }
  0x29   :  { %v49_v8 = vld [vmem:[#allocation5 + $0x4] sm:$0xf]  ;;  %v50_v9 = vld [vmem:[#allocation5 + $0x8] sm:$0xf]  ;;  %v51_v10 = vld [vmem:[#allocation5 + $0xc] sm:$0xf]  ;;  %v56_v11 = vsub.f32 %v40_v0, %v48_v7 }
  0x2a   :  { %v52_v12 = vld [vmem:[#allocation5 + $0x10] sm:$0xf]  ;;  %v386_v13 = vld [vmem:[#allocation5 + $0x14] sm:$0xf]  ;;  %v388_v14 = vld [vmem:[#allocation5 + $0x18] sm:$0xf]  ;;  %v57_v15 = vsub.f32 %v41_v1, %v49_v8  ;;  %v58_v16 = vsub.f32 %v42_v2, %v50_v9  ;;  %v59_v17 = vsub.f32 %v43_v3, %v51_v10 }
  0x2b   :  { %v60_v18 = vsub.f32 %v44_v4, %v52_v12  ;;  %v61_v19 = vsub.f32 %v45_v5, %v386_v13  ;;  %v62_v20 = vsub.f32 %v46_v6, %v388_v14  ;;  %v64_v21 = vand.u32 2147483647, %v56_v11  ;;  %v47_v25 = vld [vmem:[#allocation2 + $0x1c] sm:$0xf]  ;;  %s346_s1 = smov [#allocation7]  }
  0x2c   :  { %v65_v22 = vand.u32 2147483647, %v57_v15  ;;  %v66_v23 = vand.u32 2147483647, %v58_v16  ;;  %v67_v24 = vand.u32 2147483647, %v59_v17 }
  0x2d   :  { %v55_v26 = vld [vmem:[#allocation5 + $0x1c] sm:$0xf]  ;;  %vm72_vm0 = vcmask 1043456   ;;  %v68_v27 = vand.u32 2147483647, %v60_v18  ;;  %s239_s6 = sshll.u32 %s346_s1, 4  ;;  %s240_s6 = int_to_ptr.vmem [resolvable:$true] %s239_s6 }
  0x2e   :  { %v73_v28 = vsel %vm72_vm0, %v64_v21, 0.0  ;;  %v80_v29 = vsel %vm72_vm0, %v65_v22, 0.0  ;;  %v87_v30 = vsel %vm72_vm0, %v66_v23, 0.0  ;;  %v69_v31 = vand.u32 2147483647, %v61_v19  ;;  %s314_s7 = scalar_lea.vmem %s240_s6, 16  ;;  %p319_p3 = scmp.lt.s32.totalorder %s240_s6, %s240_s6 }
  0x2f   :  { %v70_v32 = vand.u32 2147483647, %v62_v20  ;;  %v94_v33 = vsel %vm72_vm0, %v67_v24, 0.0  ;;  %v63_v34 = vsub.f32 %v47_v25, %v55_v26  ;;  %v74_v35 = vrot.slane %v73_v28, 4  ;;  %p315_p2 = scmp.ne.s32.totalorder %s240_s6, %s314_s7  ;;  %s318_s8 = scalar_lea.vmem %s240_s6, 32 }
  0x30   :  { %v81_v36 = vrot.slane %v80_v29, 4  ;;  %v88_v37 = vrot.slane %v87_v30, 4  ;;  %v95_v38 = vrot.slane %v94_v33, 4  ;;  %v101_v39 = vsel %vm72_vm0, %v68_v27, 0.0  ;;  %p320_p4 = scmp.lt.s32.totalorder %s318_s8, %s314_s7 }
  0x31   :  { %v108_v40 = vsel %vm72_vm0, %v69_v31, 0.0  ;;  %v115_v41 = vsel %vm72_vm0, %v70_v32, 0.0  ;;  %v71_v42 = vand.u32 2147483647, %v63_v34  ;;  %v75_v43 = vadd.f32 %v74_v35, %v73_v28 }
  0x32   :  { %v82_v44 = vadd.f32 %v81_v36, %v80_v29  ;;  %v89_v45 = vadd.f32 %v88_v37, %v87_v30  ;;  %v399_v46 = vadd.f32 %v95_v38, %v94_v33  ;;  %v102_v47 = vrot.slane %v101_v39, 4  ;;  %p321_p5 = por %p320_p4, %p319_p3 }
  0x33   :  { %v109_v48 = vrot.slane %v108_v40, 4  ;;  %v116_v49 = vrot.slane %v115_v41, 4  ;;  %v76_v50 = vrot.slane %v75_v43, 2  ;;  %v402_v53 = vsel %vm72_vm0, %v71_v42, 0.0 }
  0x34   :  { %v83_v51 = vrot.slane %v82_v44, 2  ;;  %v90_v52 = vrot.slane %v89_v45, 2  ;;  %v97_v54 = vrot.slane %v399_v46, 2  ;;  %v405_v55 = vadd.f32 %v102_v47, %v101_v39  ;;  %p322_p6 = pnand %p321_p5, %p315_p2 }
  0x35   :  { %v407_v56 = vadd.f32 %v109_v48, %v108_v40  ;;  %v409_v57 = vadd.f32 %v116_v49, %v115_v41  ;;  %v123_v58 = vrot.slane %v402_v53, 4  ;;  %v129_v59 = vsel %vm72_vm0, %v48_v7, 0.0 }
  0x36   :  { %v136_v60 = vsel %vm72_vm0, %v49_v8, 0.0  ;;  %v143_v61 = vsel %vm72_vm0, %v50_v9, 0.0  ;;  %v415_v62 = vadd.f32 %v76_v50, %v75_v43  ;;  %v417_v63 = vadd.f32 %v83_v51, %v82_v44 }
  0x37   :  { %v419_v0 = vadd.f32 %v90_v52, %v89_v45  ;;  %v130_v1 = vrot.slane %v129_v59, 4  ;;  %v137_v2 = vrot.slane %v136_v60, 4  ;;  %v144_v3 = vrot.slane %v143_v61, 4 }
  0x38   :  { %v150_v4 = vsel %vm72_vm0, %v51_v10, 0.0  ;;  %v157_v5 = vsel %vm72_vm0, %v52_v12, 0.0  ;;  %v104_v6 = vrot.slane %v405_v55, 2  ;;  %v164_v16 = vsel %vm72_vm0, %v386_v13, 0.0 }
  0x39   :  { %v131_v7 = vadd.f32 %v130_v1, %v129_v59  ;;  %v151_v11 = vrot.slane %v150_v4, 4  ;;  %v158_v8 = vrot.slane %v157_v5, 4  ;;  %v138_v15 = vadd.f32 %v137_v2, %v136_v60 }
  0x3a   :  { %v145_v9 = vadd.f32 %v144_v3, %v143_v61  ;;  %v171_v17 = vsel %vm72_vm0, %v388_v14, 0.0  ;;  %v165_v21 = vrot.slane %v164_v16, 4  ;;  %v178_v23 = vsel %vm72_vm0, %v55_v26, 0.0 }
  0x3b   :  { %v132_v18 = vrot.slane %v131_v7, 2  ;;  %v152_v19 = vadd.f32 %v151_v11, %v150_v4  ;;  %v159_v20 = vadd.f32 %v158_v8, %v157_v5  ;;  %v139_v10 = vrot.slane %v138_v15, 2 }
  0x3c   :  { %v146_v22 = vrot.slane %v145_v9, 2  ;;  %v172_v12 = vrot.slane %v171_v17, 4  ;;  %v166_v28 = vadd.f32 %v165_v21, %v164_v16  ;;  %v179_v13 = vrot.slane %v178_v23, 4 }
  0x3d   :  { %v133_v24 = vadd.f32 %v132_v18, %v131_v7  ;;  %v153_v25 = vrot.slane %v152_v19, 2  ;;  %v160_v27 = vrot.slane %v159_v20, 2  ;;  %v140_v29 = vadd.f32 %v139_v10, %v138_v15 }
  0x3e   :  { %v147_v30 = vadd.f32 %v146_v22, %v145_v9  ;;  %v173_v31 = vadd.f32 %v172_v12, %v171_v17  ;;  %v167_v34 = vrot.slane %v166_v28, 2  ;;  %v180_v38 = vadd.f32 %v179_v13, %v178_v23 }
  0x3f   :  { %v134_v32 = vrot.slane %v133_v24, 1  ;;  %v154_v33 = vadd.f32 %v153_v25, %v152_v19  ;;  %v161_v14 = vadd.f32 %v160_v27, %v159_v20  ;;  %v141_v35 = vrot.slane %v140_v29, 1 }
  0x40   :  { %v148_v36 = vrot.slane %v147_v30, 1  ;;  %v174_v37 = vrot.slane %v173_v31, 2  ;;  %v168_v26 = vadd.f32 %v167_v34, %v166_v28  ;;  %v181_v45 = vrot.slane %v180_v38, 2 }
  0x41   :  { %v135_v39 = vadd.f32 %v134_v32, %v133_v24  ;;  %v155_v40 = vrot.slane %v154_v33, 1  ;;  %v162_v41 = vrot.slane %v161_v14, 1  ;;  %v142_v42 = vadd.f32 %v141_v35, %v140_v29 }
  0x42   :  { %v149_v43 = vadd.f32 %v148_v36, %v147_v30  ;;  %v175_v44 = vadd.f32 %v174_v37, %v173_v31  ;;  %v169_v49 = vrot.slane %v168_v26, 1  ;;  %v182_v52 = vadd.f32 %v181_v45, %v180_v38 }
  0x43   :  { %v156_v47 = vadd.f32 %v155_v40, %v154_v33  ;;  %v163_v48 = vadd.f32 %v162_v41, %v161_v14  ;;  %v185_v50 = vmul.f32 0.25, %v135_v39  ;;  %v186_v59 = vmul.f32 0.25, %v142_v42 }
  0x44   :  { %v176_v51 = vrot.slane %v175_v44, 1  ;;  %v187_v60 = vmul.f32 0.25, %v149_v43  ;;  %v170_v61 = vadd.f32 %v169_v49, %v168_v26  ;;  %v183_v5 = vrot.slane %v182_v52, 1 }
  0x45   :  { %v188_v1 = vmul.f32 0.25, %v156_v47  ;;  %v189_v2 = vmul.f32 0.25, %v163_v48  ;;  %v193_v3 = vand.u32 2147483647, %v185_v50  ;;  %v194_v7 = vand.u32 2147483647, %v186_v59 }
  0x46   :  { %v177_v4 = vadd.f32 %v176_v51, %v175_v44  ;;  %v195_v11 = vand.u32 2147483647, %v187_v60  ;;  %v190_v8 = vmul.f32 0.25, %v170_v61  ;;  %v184_v17 = vadd.f32 %v183_v5, %v182_v52 }
  0x47   :  { %v196_v15 = vand.u32 2147483647, %v188_v1  ;;  %v197_v9 = vand.u32 2147483647, %v189_v2  ;;  %v201_v16 = vadd.f32 1.0, %v193_v3  ;;  %v202_v19 = vadd.f32 1.0, %v194_v7 }
  0x48   :  { %v191_v18 = vmul.f32 0.25, %v177_v4  ;;  %v203_v20 = vadd.f32 1.0, %v195_v11  ;;  %v198_v21 = vand.u32 2147483647, %v190_v8  ;;  %v98_v12 = vadd.f32 %v97_v54, %v399_v46 }
  0x49   :  { %v204_v10 = vadd.f32 1.0, %v196_v15  ;;  %v205_v22 = vadd.f32 1.0, %v197_v9  ;;  %254 = vrcp.f32 %v201_v16  ;;  %v192_v23 = vmul.f32 0.25, %v184_v17 }
  0x4a   :  { %v199_v24 = vand.u32 2147483647, %v191_v18  ;;  %256 = vrcp.f32 %v202_v19  ;;  %v111_v25 = vrot.slane %v407_v56, 2  ;;  %v124_v27 = vadd.f32 %v123_v58, %v402_v53 }
  0x4b   :  { %v206_v28 = vadd.f32 1.0, %v198_v21  ;;  %258 = vrcp.f32 %v203_v20  ;;  %v78_v29 = vrot.slane %v415_v62, 1  ;;  %v200_v30 = vand.u32 2147483647, %v192_v23 }
  0x4c   :  { %v207_v31 = vadd.f32 1.0, %v199_v24  ;;  %260 = vrcp.f32 %v204_v10  ;;  %v85_v13 = vrot.slane %v417_v63, 1  ;;  %v105_v46 = vadd.f32 %v104_v6, %v405_v55 }
  0x4d   :  { %v118_v54 = vrot.slane %v409_v57, 2  ;;  %262 = vrcp.f32 %v205_v22  ;;  %v92_v32 = vrot.slane %v419_v0, 1  ;;  %v208_v33 = vadd.f32 1.0, %v200_v30 }
  0x4e   :  { %264 = vrcp.f32 %v206_v28  ;;  %v99_v53 = vrot.slane %v98_v12, 1  ;;  %v112_v58 = vadd.f32 %v111_v25, %v407_v56  ;;  %v125_v14 = vrot.slane %v124_v27, 2 }
  0x4f   :  { %v79_v34 = vadd.f32 %v78_v29, %v415_v62  ;;  %266 = vrcp.f32 %v207_v31  ;;  %v86_v35 = vadd.f32 %v85_v13, %v417_v63  ;;  %v106_v36 = vrot.slane %v105_v46, 1 }
  0x50   :  { %v119_v37 = vadd.f32 %v118_v54, %v409_v57  ;;  %v93_v55 = vadd.f32 %v92_v32, %v419_v0  ;;  %268 = vrcp.f32 %v208_v33  ;;  %v100_v38 = vadd.f32 %v99_v53, %v98_v12 }
  0x51   :  { %v113_v39 = vrot.slane %v112_v58, 1  ;;  %v126_v40 = vadd.f32 %v125_v14, %v124_v27  ;;  %v107_v56 = vadd.f32 %v106_v36, %v105_v46 }
  0x52   :  { %v120_v43 = vrot.slane %v119_v37, 1 }
  0x53   :  { %v255_v6 = vpop.eup %254  ;;  %v114_v63 = vadd.f32 %v113_v39, %v112_v58  ;;  %v127_v48 = vrot.slane %v126_v40, 1 }
  0x54   :  { %v257_v41 = vpop.eup %256  ;;  %v217_v26 = vmul.f32 %v255_v6, %v79_v34  ;;  %v121_v0 = vadd.f32 %v120_v43, %v119_v37 }
  0x55   :  { %v259_v42 = vpop.eup %258  ;;  %v218_v44 = vmul.f32 %v257_v41, %v86_v35  ;;  %v128_v60 = vadd.f32 %v127_v48, %v126_v40 }
  0x56   :  { %v261_v62 = vpop.eup %260  ;;  %v219_v45 = vmul.f32 %v259_v42, %v93_v55 }
  0x57   :  { %v263_v47 = vpop.eup %262  ;;  %v220_v49 = vmul.f32 %v261_v62, %v100_v38  ;;  %v225_v57 = vadd.f32 %v218_v44, %v217_v26 }
  0x58   :  { %v265_v50 = vpop.eup %264  ;;  %v221_v51 = vmul.f32 %v263_v47, %v107_v56 }
  0x59   :  { %v226_v52 = vadd.f32 %v225_v57, %v219_v45  ;;  %v267_v59 = vpop.eup %266  ;;  %v222_v61 = vmul.f32 %v265_v50, %v114_v63 }
  0x5a   :  { %v269_v2 = vpop.eup %268  ;;  %v223_v3 = vmul.f32 %v267_v59, %v121_v0 }
  0x5b   :  { %v227_v1 = vadd.f32 %v226_v52, %v220_v49  ;;  %v224_v5 = vmul.f32 %v269_v2, %v128_v60 }
  0x5d   :  { %v228_v4 = vadd.f32 %v227_v1, %v221_v51 }
  0x5f   :  { %v229_v7 = vadd.f32 %v228_v4, %v222_v61 }
  0x61   :  { %v230_v11 = vadd.f32 %v229_v7, %v223_v3 }
  0x63   :  { %v231_v8 = vadd.f32 %v230_v11, %v224_v5 }
  0x65   :  { %232 = vst [vmem:[#allocation7] sm:$0x1] %v231_v8 }
  0x66   :  { %325 = shalt.err (!%p322_p6)
}
  0x67   :  { %s326_s11 = scalar_lea.hbm %s462_s2, 16 }
  0x68   :  { %p327_p7 = scmp.ne.s32.totalorder %s462_s2, %s326_s11  ;;  %p330_p8 = scmp.lt.u32.totalorder %s326_s11, %s462_s2 }
  0x6a   :  { %p332_p9 = pnand %p330_p8, %p327_p7 }
  0x6c   :  { %335 = shalt.err (!%p332_p9)
}
  0x6d   :  { %242 = dma.vmem_to_hbm [thread:$0]  %s240_s6, 16, %s462_s2, [#allocation4]  }
  0x6e   :  { %340 = dma.done.wait [#allocation4], 16  }
  0x6f   :  { %341 = vsyncadd [#allocation4], 4294967280 }
  0x70   :  { %246 = vsyncpa [#allocation3], 1 }
  0x71   :  { %247 = vsyncpa [#allocation6], 1 }
  0x72   :  { %248 = vsyncpa [#allocation4], 1 }

</bundles_post_ra>
